<compile_context>
chip_gen: v7x
topology: tpu7x:2x2x1
jax: 0.10.0
libtpu: 0.0.40
codegen_flags: <defaults>
</compile_context>

<pallas_src>
import functools
import math

import jax
import jax.numpy as jnp
from jax.experimental import pallas as pl
from jax.experimental.pallas import tpu as pltpu

RECURRENT_BF16 = True   # bf16 operands on the serial recurrent matmuls (f32 accum)
SUBLANE = 8             # f32 sublane tile
LANE = 128              # lane width


# ----------------------------------------------------------------------------
# Fused kernel: multi-layer tanh RNN (layer wavefront) + 3 Linear heads
# ----------------------------------------------------------------------------
def _fused_rnn_heads_kernel(num_layers, seq_len, batch_pad, *refs):
    """refs = (x_ref,                        # (T*Bp, D)  time-major, batch-padded
               [w_ih_T, w_hh_T, bias] * L,   # (D_in,H), (H,H), (1,H); bias=b_ih+b_hh
               wh_ref, bh_ref,               # (T*H, NC_pad), (1, NC_pad)
               out_ref)                      # (Bp, NC_pad)
    """
    x_ref = refs[0]
    layer_refs = refs[1:1 + 3 * num_layers]
    wh_ref = refs[1 + 3 * num_layers]
    bh_ref = refs[2 + 3 * num_layers]
    out_ref = refs[3 + 3 * num_layers]

    L, T, Bp = num_layers, seq_len, batch_pad
    H = layer_refs[1].shape[0]
    NCp = wh_ref.shape[1]

    cdt = jnp.bfloat16 if RECURRENT_BF16 else jnp.float32

    # Layer-0 input projection hoisted out of the recurrence (time-parallel),
    # with b_ih + b_hh already folded in host-side.
    xw = (jnp.dot(x_ref[...], layer_refs[0][...],
                  preferred_element_type=jnp.float32)
          + layer_refs[2][...])                                  # (T*Bp, H)

    # Load / cast the small recurrent weights once, outside the loop.
    w_hh = [layer_refs[3 * l + 1][...].astype(cdt) for l in range(L)]
    w_ih = [None] + [layer_refs[3 * l][...].astype(cdt) for l in range(1, L)]
    bias = [None] + [layer_refs[3 * l + 2][...] for l in range(1, L)]

    hs = [jnp.zeros((Bp, H), jnp.float32) for _ in range(L)]     # h0 = 0 (all layers)
    acc = jnp.zeros((Bp, NCp), jnp.float32)                      # head accumulator

    # Wavefront over layers: at wave w, layer l computes time step t = w - l,
    # reading hs[l-1] from the *previous* wave's snapshot. The serial
    # matmul->tanh chain is T + L - 1 long instead of T * L; the per-wave
    # matmuls of different layers are independent and pipeline on the MXU.
    for w in range(T + L - 1):
        new_hs = list(hs)
        for l in range(L):
            t = w - l
            if not (0 <= t < T):
                continue
            if l == 0:
                pre = xw[t * Bp:(t + 1) * Bp, :]                 # aligned 8-row slice
            else:
                pre = (jnp.dot(hs[l - 1].astype(cdt), w_ih[l],
                               preferred_element_type=jnp.float32) + bias[l])
            if t > 0:                                            # h_l(-1)==0: skip zero matmul
                pre = pre + jnp.dot(hs[l].astype(cdt), w_hh[l],
                                    preferred_element_type=jnp.float32)
            h_new = jnp.tanh(pre)                                # f32 VPU/EUP (v5e-safe)
            new_hs[l] = h_new
            if l == L - 1:
                # Fold the FC heads into the loop: off the serial chain, so this
                # (8,32)x(32,128) accumulate hides under the recurrence.
                acc = acc + jnp.dot(h_new, wh_ref[t * H:(t + 1) * H, :],
                                    preferred_element_type=jnp.float32)
        hs = new_hs

    out_ref[...] = acc + bh_ref[...]


# ----------------------------------------------------------------------------
# Parameter init (PyTorch-style uniform init, deterministic)
# ----------------------------------------------------------------------------
def init_params(key, input_size, hidden_size, num_layers, nc1, nc2, nc3):
    seq_len, feat = input_size
    rnn_layers = []
    bound = 1.0 / math.sqrt(hidden_size)
    k = key
    for l in range(num_layers):
        in_dim = feat if l == 0 else hidden_size
        k, k1, k2, k3, k4 = jax.random.split(k, 5)
        w_ih = jax.random.uniform(k1, (hidden_size, in_dim), jnp.float32, -bound, bound)
        w_hh = jax.random.uniform(k2, (hidden_size, hidden_size), jnp.float32, -bound, bound)
        b_ih = jax.random.uniform(k3, (hidden_size,), jnp.float32, -bound, bound)
        b_hh = jax.random.uniform(k4, (hidden_size,), jnp.float32, -bound, bound)
        rnn_layers.append((w_ih, w_hh, b_ih, b_hh))

    fc_in = hidden_size * seq_len
    fb = 1.0 / math.sqrt(fc_in)
    heads = []
    for nc in (nc1, nc2, nc3):
        k, k1, k2 = jax.random.split(k, 3)
        w = jax.random.uniform(k1, (nc, fc_in), jnp.float32, -fb, fb)
        b = jax.random.uniform(k2, (nc,), jnp.float32, -fb, fb)
        heads.append((w, b))
    return rnn_layers, heads


# ----------------------------------------------------------------------------
# One-time host-side weight plumbing (runs once, NOT per forward call)
# ----------------------------------------------------------------------------
def prepare_params(rnn_layers, heads):
    flat_rnn = []
    for (w_ih, w_hh, b_ih, b_hh) in rnn_layers:
        flat_rnn += [jnp.asarray(w_ih.T, jnp.float32),
                     jnp.asarray(w_hh.T, jnp.float32),
                     jnp.asarray((b_ih + b_hh).reshape(1, -1), jnp.float32)]

    (w1, b1), (w2, b2), (w3, b3) = heads
    ncs = (w1.shape[0], w2.shape[0], w3.shape[0])
    nc_total = sum(ncs)
    nc_pad = ((nc_total + LANE - 1) // LANE) * LANE              # lane-dense output
    w_cat = jnp.concatenate([w1.T, w2.T, w3.T], axis=1)          # (T*H, NC_total)
    w_cat = jnp.pad(w_cat, ((0, 0), (0, nc_pad - nc_total))).astype(jnp.float32)
    b_cat = jnp.pad(jnp.concatenate([b1, b2, b3]),
                    (0, nc_pad - nc_total)).reshape(1, -1).astype(jnp.float32)
    return tuple(flat_rnn), w_cat, b_cat, ncs


# ----------------------------------------------------------------------------
# Jitted forward (glue + single fused pallas_call)
# ----------------------------------------------------------------------------
def make_rnn_forward(num_layers, ncs):
    nc1, nc2, nc3 = ncs

    @jax.jit
    def forward(x, flat_rnn, w_cat, b_cat):
        if x.ndim == 2:              # mirrors `if x.dim() == 2: x = x.unsqueeze(0)`
            x = x[None]
        x = x.astype(jnp.float32)
        B, T, D = x.shape

        # Pad batch to the f32 sublane tile; padded rows compute garbage that is
        # sliced off below (before the B==1 squeeze).
        Bp = max(SUBLANE, ((B + SUBLANE - 1) // SUBLANE) * SUBLANE)
        x_p = jnp.zeros((Bp, T, D), jnp.float32).at[:B].set(x)
        x_tm = jnp.transpose(x_p, (1, 0, 2)).reshape(T * Bp, D)  # time-major

        nc_pad = w_cat.shape[1]
        vmem = pl.BlockSpec(memory_space=pltpu.MemorySpace.VMEM)
        n_in = 1 + len(flat_rnn) + 2

        # Gridless single-block launch: any grid here is pure ~0.35us/step
        # sequential overhead at this size and the recurrence axis can't be
        # parallelized. TODO(synk): if B grows to hundreds of rows, add a batch
        # grid axis with dimension_semantics=("parallel",) so v7x's two
        # TensorCores split the batch, and re-derive VMEM vs v7x's 64 MiB.
        out = pl.pallas_call(
            functools.partial(_fused_rnn_heads_kernel, num_layers, T, Bp),
            out_shape=jax.ShapeDtypeStruct((Bp, nc_pad), jnp.float32),
            in_specs=[vmem] * n_in,
            out_specs=vmem,
        )(x_tm, *flat_rnn, w_cat, b_cat)

        out = out[:B]
        o1 = out[:, :nc1]
        o2 = out[:, nc1:nc1 + nc2]
        o3 = out[:, nc1 + nc2:nc1 + nc2 + nc3]
        if B == 1:                   # PyTorch squeezes `out` when batch == 1
            o1, o2, o3 = o1[0], o2[0], o3[0]
        return o1, o2, o3

    return forward


# ----------------------------------------------------------------------------
# Main
# ----------------------------------------------------------------------------
if __name__ == "__main__":
    # Module hyper-params: input_size = (seq_len, feature_dim)
    SEQ_LEN, FEAT = 8, 16
    HIDDEN = 32
    NUM_LAYERS = 2
    NC1, NC2, NC3 = 3, 5, 7
    B = 2

    key = jax.random.PRNGKey(0)
    k_param, k_x = jax.random.split(key)
    rnn_layers, heads = init_params(k_param, (SEQ_LEN, FEAT), HIDDEN,
                                    NUM_LAYERS, NC1, NC2, NC3)

    # One-time weight packing + jitted forward.
    flat_rnn, w_cat, b_cat, ncs = prepare_params(rnn_layers, heads)
    forward = make_rnn_forward(NUM_LAYERS, ncs)

    x = jax.random.normal(k_x, (B, SEQ_LEN, FEAT), jnp.float32)

    x1, x2, x3 = forward(x, flat_rnn, w_cat, b_cat)
    jax.block_until_ready((x1, x2, x3))

    assert x1.shape == (B, NC1) and x2.shape == (B, NC2) and x3.shape == (B, NC3)
    assert all(bool(jnp.all(jnp.isfinite(v))) for v in (x1, x2, x3))
    print("KERNEL_OK")
</pallas_src>

<mosaic_0001>
module attributes {stable_mosaic.version = 11 : i64} {
  func.func @_fused_rnn_heads_kernel(%arg0: memref<64x16xf32, #tpu.memory_space<vmem>>, %arg1: memref<16x32xf32, #tpu.memory_space<vmem>>, %arg2: memref<32x32xf32, #tpu.memory_space<vmem>>, %arg3: memref<1x32xf32, #tpu.memory_space<vmem>>, %arg4: memref<32x32xf32, #tpu.memory_space<vmem>>, %arg5: memref<32x32xf32, #tpu.memory_space<vmem>>, %arg6: memref<1x32xf32, #tpu.memory_space<vmem>>, %arg7: memref<256x128xf32, #tpu.memory_space<vmem>>, %arg8: memref<1x128xf32, #tpu.memory_space<vmem>>, %arg9: memref<8x128xf32, #tpu.memory_space<vmem>>) attributes {dimension_semantics = [], scalar_prefetch = 0 : i64, scratch_operands = 0 : i64, tpu.core_type = #tpu.core_type<tc>} {
    %c0 = arith.constant 0 : index
    %c0_0 = arith.constant 0 : index
    %0 = vector.load %arg0[%c0, %c0_0] : memref<64x16xf32, #tpu.memory_space<vmem>>, vector<64x16xf32>
    %c0_1 = arith.constant 0 : index
    %c0_2 = arith.constant 0 : index
    %1 = vector.load %arg1[%c0_1, %c0_2] : memref<16x32xf32, #tpu.memory_space<vmem>>, vector<16x32xf32>
    %cst = arith.constant dense<0.000000e+00> : vector<64x32xf32>
    %2 = tpu.matmul %0, %1, %cst {dimension_numbers = #tpu.dot_dimension_numbers<[1], [0], [0], [1], [0, 0, 1, 1], [], []>} : vector<64x16xf32>, vector<16x32xf32>, vector<64x32xf32> -> vector<64x32xf32>
    %c0_3 = arith.constant 0 : index
    %c0_4 = arith.constant 0 : index
    %3 = vector.load %arg3[%c0_3, %c0_4] : memref<1x32xf32, #tpu.memory_space<vmem>>, vector<1x32xf32>
    %4 = vector.broadcast %3 : vector<1x32xf32> to vector<64x32xf32>
    %5 = arith.addf %2, %4 : vector<64x32xf32>
    %c0_5 = arith.constant 0 : index
    %c0_6 = arith.constant 0 : index
    %6 = vector.load %arg2[%c0_5, %c0_6] : memref<32x32xf32, #tpu.memory_space<vmem>>, vector<32x32xf32>
    %7 = arith.truncf %6 : vector<32x32xf32> to vector<32x32xbf16>
    %c0_7 = arith.constant 0 : index
    %c0_8 = arith.constant 0 : index
    %8 = vector.load %arg5[%c0_7, %c0_8] : memref<32x32xf32, #tpu.memory_space<vmem>>, vector<32x32xf32>
    %9 = arith.truncf %8 : vector<32x32xf32> to vector<32x32xbf16>
    %c0_9 = arith.constant 0 : index
    %c0_10 = arith.constant 0 : index
    %10 = vector.load %arg4[%c0_9, %c0_10] : memref<32x32xf32, #tpu.memory_space<vmem>>, vector<32x32xf32>
    %11 = arith.truncf %10 : vector<32x32xf32> to vector<32x32xbf16>
    %c0_11 = arith.constant 0 : index
    %c0_12 = arith.constant 0 : index
    %12 = vector.load %arg6[%c0_11, %c0_12] : memref<1x32xf32, #tpu.memory_space<vmem>>, vector<1x32xf32>
    %cst_13 = arith.constant 0.000000e+00 : f32
    %13 = vector.broadcast %cst_13 : f32 to vector<8x128xf32>
    %14 = vector.extract_strided_slice %5 {offsets = [0, 0], sizes = [8, 32], strides = [1, 1]} : vector<64x32xf32> to vector<8x32xf32>
    %15 = math.tanh %14 : vector<8x32xf32>
    %16 = vector.extract_strided_slice %5 {offsets = [8, 0], sizes = [8, 32], strides = [1, 1]} : vector<64x32xf32> to vector<8x32xf32>
    %17 = arith.truncf %15 : vector<8x32xf32> to vector<8x32xbf16>
    %cst_14 = arith.constant dense<0.000000e+00> : vector<8x32xf32>
    %18 = tpu.matmul %17, %7, %cst_14 {dimension_numbers = #tpu.dot_dimension_numbers<[1], [0], [0], [1], [0, 0, 1, 1], [], []>} : vector<8x32xbf16>, vector<32x32xbf16>, vector<8x32xf32> -> vector<8x32xf32>
    %19 = arith.addf %16, %18 : vector<8x32xf32>
    %20 = math.tanh %19 : vector<8x32xf32>
    %21 = arith.truncf %15 : vector<8x32xf32> to vector<8x32xbf16>
    %cst_15 = arith.constant dense<0.000000e+00> : vector<8x32xf32>
    %22 = tpu.matmul %21, %11, %cst_15 {dimension_numbers = #tpu.dot_dimension_numbers<[1], [0], [0], [1], [0, 0, 1, 1], [], []>} : vector<8x32xbf16>, vector<32x32xbf16>, vector<8x32xf32> -> vector<8x32xf32>
    %23 = vector.broadcast %12 : vector<1x32xf32> to vector<8x32xf32>
    %24 = arith.addf %22, %23 : vector<8x32xf32>
    %25 = math.tanh %24 : vector<8x32xf32>
    %c0_16 = arith.constant 0 : index
    %c0_17 = arith.constant 0 : index
    %26 = vector.load %arg7[%c0_16, %c0_17] : memref<256x128xf32, #tpu.memory_space<vmem>>, vector<32x128xf32>
    %cst_18 = arith.constant dense<0.000000e+00> : vector<8x128xf32>
    %27 = tpu.matmul %25, %26, %cst_18 {dimension_numbers = #tpu.dot_dimension_numbers<[1], [0], [0], [1], [0, 0, 1, 1], [], []>} : vector<8x32xf32>, vector<32x128xf32>, vector<8x128xf32> -> vector<8x128xf32>
    %28 = arith.addf %13, %27 : vector<8x128xf32>
    %29 = vector.extract_strided_slice %5 {offsets = [16, 0], sizes = [8, 32], strides = [1, 1]} : vector<64x32xf32> to vector<8x32xf32>
    %30 = arith.truncf %20 : vector<8x32xf32> to vector<8x32xbf16>
    %cst_19 = arith.constant dense<0.000000e+00> : vector<8x32xf32>
    %31 = tpu.matmul %30, %7, %cst_19 {dimension_numbers = #tpu.dot_dimension_numbers<[1], [0], [0], [1], [0, 0, 1, 1], [], []>} : vector<8x32xbf16>, vector<32x32xbf16>, vector<8x32xf32> -> vector<8x32xf32>
    %32 = arith.addf %29, %31 : vector<8x32xf32>
    %33 = math.tanh %32 : vector<8x32xf32>
    %34 = arith.truncf %20 : vector<8x32xf32> to vector<8x32xbf16>
    %cst_20 = arith.constant dense<0.000000e+00> : vector<8x32xf32>
    %35 = tpu.matmul %34, %11, %cst_20 {dimension_numbers = #tpu.dot_dimension_numbers<[1], [0], [0], [1], [0, 0, 1, 1], [], []>} : vector<8x32xbf16>, vector<32x32xbf16>, vector<8x32xf32> -> vector<8x32xf32>
    %36 = vector.broadcast %12 : vector<1x32xf32> to vector<8x32xf32>
    %37 = arith.addf %35, %36 : vector<8x32xf32>
    %38 = arith.truncf %25 : vector<8x32xf32> to vector<8x32xbf16>
    %cst_21 = arith.constant dense<0.000000e+00> : vector<8x32xf32>
    %39 = tpu.matmul %38, %9, %cst_21 {dimension_numbers = #tpu.dot_dimension_numbers<[1], [0], [0], [1], [0, 0, 1, 1], [], []>} : vector<8x32xbf16>, vector<32x32xbf16>, vector<8x32xf32> -> vector<8x32xf32>
    %40 = arith.addf %37, %39 : vector<8x32xf32>
    %41 = math.tanh %40 : vector<8x32xf32>
    %c32 = arith.constant 32 : index
    %c0_22 = arith.constant 0 : index
    %42 = vector.load %arg7[%c32, %c0_22] : memref<256x128xf32, #tpu.memory_space<vmem>>, vector<32x128xf32>
    %cst_23 = arith.constant dense<0.000000e+00> : vector<8x128xf32>
    %43 = tpu.matmul %41, %42, %cst_23 {dimension_numbers = #tpu.dot_dimension_numbers<[1], [0], [0], [1], [0, 0, 1, 1], [], []>} : vector<8x32xf32>, vector<32x128xf32>, vector<8x128xf32> -> vector<8x128xf32>
    %44 = arith.addf %28, %43 : vector<8x128xf32>
    %45 = vector.extract_strided_slice %5 {offsets = [24, 0], sizes = [8, 32], strides = [1, 1]} : vector<64x32xf32> to vector<8x32xf32>
    %46 = arith.truncf %33 : vector<8x32xf32> to vector<8x32xbf16>
    %cst_24 = arith.constant dense<0.000000e+00> : vector<8x32xf32>
    %47 = tpu.matmul %46, %7, %cst_24 {dimension_numbers = #tpu.dot_dimension_numbers<[1], [0], [0], [1], [0, 0, 1, 1], [], []>} : vector<8x32xbf16>, vector<32x32xbf16>, vector<8x32xf32> -> vector<8x32xf32>
    %48 = arith.addf %45, %47 : vector<8x32xf32>
    %49 = math.tanh %48 : vector<8x32xf32>
    %50 = arith.truncf %33 : vector<8x32xf32> to vector<8x32xbf16>
    %cst_25 = arith.constant dense<0.000000e+00> : vector<8x32xf32>
    %51 = tpu.matmul %50, %11, %cst_25 {dimension_numbers = #tpu.dot_dimension_numbers<[1], [0], [0], [1], [0, 0, 1, 1], [], []>} : vector<8x32xbf16>, vector<32x32xbf16>, vector<8x32xf32> -> vector<8x32xf32>
    %52 = vector.broadcast %12 : vector<1x32xf32> to vector<8x32xf32>
    %53 = arith.addf %51, %52 : vector<8x32xf32>
    %54 = arith.truncf %41 : vector<8x32xf32> to vector<8x32xbf16>
    %cst_26 = arith.constant dense<0.000000e+00> : vector<8x32xf32>
    %55 = tpu.matmul %54, %9, %cst_26 {dimension_numbers = #tpu.dot_dimension_numbers<[1], [0], [0], [1], [0, 0, 1, 1], [], []>} : vector<8x32xbf16>, vector<32x32xbf16>, vector<8x32xf32> -> vector<8x32xf32>
    %56 = arith.addf %53, %55 : vector<8x32xf32>
    %57 = math.tanh %56 : vector<8x32xf32>
    %c64 = arith.constant 64 : index
    %c0_27 = arith.constant 0 : index
    %58 = vector.load %arg7[%c64, %c0_27] : memref<256x128xf32, #tpu.memory_space<vmem>>, vector<32x128xf32>
    %cst_28 = arith.constant dense<0.000000e+00> : vector<8x128xf32>
    %59 = tpu.matmul %57, %58, %cst_28 {dimension_numbers = #tpu.dot_dimension_numbers<[1], [0], [0], [1], [0, 0, 1, 1], [], []>} : vector<8x32xf32>, vector<32x128xf32>, vector<8x128xf32> -> vector<8x128xf32>
    %60 = arith.addf %44, %59 : vector<8x128xf32>
    %61 = vector.extract_strided_slice %5 {offsets = [32, 0], sizes = [8, 32], strides = [1, 1]} : vector<64x32xf32> to vector<8x32xf32>
    %62 = arith.truncf %49 : vector<8x32xf32> to vector<8x32xbf16>
    %cst_29 = arith.constant dense<0.000000e+00> : vector<8x32xf32>
    %63 = tpu.matmul %62, %7, %cst_29 {dimension_numbers = #tpu.dot_dimension_numbers<[1], [0], [0], [1], [0, 0, 1, 1], [], []>} : vector<8x32xbf16>, vector<32x32xbf16>, vector<8x32xf32> -> vector<8x32xf32>
    %64 = arith.addf %61, %63 : vector<8x32xf32>
    %65 = math.tanh %64 : vector<8x32xf32>
    %66 = arith.truncf %49 : vector<8x32xf32> to vector<8x32xbf16>
    %cst_30 = arith.constant dense<0.000000e+00> : vector<8x32xf32>
    %67 = tpu.matmul %66, %11, %cst_30 {dimension_numbers = #tpu.dot_dimension_numbers<[1], [0], [0], [1], [0, 0, 1, 1], [], []>} : vector<8x32xbf16>, vector<32x32xbf16>, vector<8x32xf32> -> vector<8x32xf32>
    %68 = vector.broadcast %12 : vector<1x32xf32> to vector<8x32xf32>
    %69 = arith.addf %67, %68 : vector<8x32xf32>
    %70 = arith.truncf %57 : vector<8x32xf32> to vector<8x32xbf16>
    %cst_31 = arith.constant dense<0.000000e+00> : vector<8x32xf32>
    %71 = tpu.matmul %70, %9, %cst_31 {dimension_numbers = #tpu.dot_dimension_numbers<[1], [0], [0], [1], [0, 0, 1, 1], [], []>} : vector<8x32xbf16>, vector<32x32xbf16>, vector<8x32xf32> -> vector<8x32xf32>
    %72 = arith.addf %69, %71 : vector<8x32xf32>
    %73 = math.tanh %72 : vector<8x32xf32>
    %c96 = arith.constant 96 : index
    %c0_32 = arith.constant 0 : index
    %74 = vector.load %arg7[%c96, %c0_32] : memref<256x128xf32, #tpu.memory_space<vmem>>, vector<32x128xf32>
    %cst_33 = arith.constant dense<0.000000e+00> : vector<8x128xf32>
    %75 = tpu.matmul %73, %74, %cst_33 {dimension_numbers = #tpu.dot_dimension_numbers<[1], [0], [0], [1], [0, 0, 1, 1], [], []>} : vector<8x32xf32>, vector<32x128xf32>, vector<8x128xf32> -> vector<8x128xf32>
    %76 = arith.addf %60, %75 : vector<8x128xf32>
    %77 = vector.extract_strided_slice %5 {offsets = [40, 0], sizes = [8, 32], strides = [1, 1]} : vector<64x32xf32> to vector<8x32xf32>
    %78 = arith.truncf %65 : vector<8x32xf32> to vector<8x32xbf16>
    %cst_34 = arith.constant dense<0.000000e+00> : vector<8x32xf32>
    %79 = tpu.matmul %78, %7, %cst_34 {dimension_numbers = #tpu.dot_dimension_numbers<[1], [0], [0], [1], [0, 0, 1, 1], [], []>} : vector<8x32xbf16>, vector<32x32xbf16>, vector<8x32xf32> -> vector<8x32xf32>
    %80 = arith.addf %77, %79 : vector<8x32xf32>
    %81 = math.tanh %80 : vector<8x32xf32>
    %82 = arith.truncf %65 : vector<8x32xf32> to vector<8x32xbf16>
    %cst_35 = arith.constant dense<0.000000e+00> : vector<8x32xf32>
    %83 = tpu.matmul %82, %11, %cst_35 {dimension_numbers = #tpu.dot_dimension_numbers<[1], [0], [0], [1], [0, 0, 1, 1], [], []>} : vector<8x32xbf16>, vector<32x32xbf16>, vector<8x32xf32> -> vector<8x32xf32>
    %84 = vector.broadcast %12 : vector<1x32xf32> to vector<8x32xf32>
    %85 = arith.addf %83, %84 : vector<8x32xf32>
    %86 = arith.truncf %73 : vector<8x32xf32> to vector<8x32xbf16>
    %cst_36 = arith.constant dense<0.000000e+00> : vector<8x32xf32>
    %87 = tpu.matmul %86, %9, %cst_36 {dimension_numbers = #tpu.dot_dimension_numbers<[1], [0], [0], [1], [0, 0, 1, 1], [], []>} : vector<8x32xbf16>, vector<32x32xbf16>, vector<8x32xf32> -> vector<8x32xf32>
    %88 = arith.addf %85, %87 : vector<8x32xf32>
    %89 = math.tanh %88 : vector<8x32xf32>
    %c128 = arith.constant 128 : index
    %c0_37 = arith.constant 0 : index
    %90 = vector.load %arg7[%c128, %c0_37] : memref<256x128xf32, #tpu.memory_space<vmem>>, vector<32x128xf32>
    %cst_38 = arith.constant dense<0.000000e+00> : vector<8x128xf32>
    %91 = tpu.matmul %89, %90, %cst_38 {dimension_numbers = #tpu.dot_dimension_numbers<[1], [0], [0], [1], [0, 0, 1, 1], [], []>} : vector<8x32xf32>, vector<32x128xf32>, vector<8x128xf32> -> vector<8x128xf32>
    %92 = arith.addf %76, %91 : vector<8x128xf32>
    %93 = vector.extract_strided_slice %5 {offsets = [48, 0], sizes = [8, 32], strides = [1, 1]} : vector<64x32xf32> to vector<8x32xf32>
    %94 = arith.truncf %81 : vector<8x32xf32> to vector<8x32xbf16>
    %cst_39 = arith.constant dense<0.000000e+00> : vector<8x32xf32>
    %95 = tpu.matmul %94, %7, %cst_39 {dimension_numbers = #tpu.dot_dimension_numbers<[1], [0], [0], [1], [0, 0, 1, 1], [], []>} : vector<8x32xbf16>, vector<32x32xbf16>, vector<8x32xf32> -> vector<8x32xf32>
    %96 = arith.addf %93, %95 : vector<8x32xf32>
    %97 = math.tanh %96 : vector<8x32xf32>
    %98 = arith.truncf %81 : vector<8x32xf32> to vector<8x32xbf16>
    %cst_40 = arith.constant dense<0.000000e+00> : vector<8x32xf32>
    %99 = tpu.matmul %98, %11, %cst_40 {dimension_numbers = #tpu.dot_dimension_numbers<[1], [0], [0], [1], [0, 0, 1, 1], [], []>} : vector<8x32xbf16>, vector<32x32xbf16>, vector<8x32xf32> -> vector<8x32xf32>
    %100 = vector.broadcast %12 : vector<1x32xf32> to vector<8x32xf32>
    %101 = arith.addf %99, %100 : vector<8x32xf32>
    %102 = arith.truncf %89 : vector<8x32xf32> to vector<8x32xbf16>
    %cst_41 = arith.constant dense<0.000000e+00> : vector<8x32xf32>
    %103 = tpu.matmul %102, %9, %cst_41 {dimension_numbers = #tpu.dot_dimension_numbers<[1], [0], [0], [1], [0, 0, 1, 1], [], []>} : vector<8x32xbf16>, vector<32x32xbf16>, vector<8x32xf32> -> vector<8x32xf32>
    %104 = arith.addf %101, %103 : vector<8x32xf32>
    %105 = math.tanh %104 : vector<8x32xf32>
    %c160 = arith.constant 160 : index
    %c0_42 = arith.constant 0 : index
    %106 = vector.load %arg7[%c160, %c0_42] : memref<256x128xf32, #tpu.memory_space<vmem>>, vector<32x128xf32>
    %cst_43 = arith.constant dense<0.000000e+00> : vector<8x128xf32>
    %107 = tpu.matmul %105, %106, %cst_43 {dimension_numbers = #tpu.dot_dimension_numbers<[1], [0], [0], [1], [0, 0, 1, 1], [], []>} : vector<8x32xf32>, vector<32x128xf32>, vector<8x128xf32> -> vector<8x128xf32>
    %108 = arith.addf %92, %107 : vector<8x128xf32>
    %109 = vector.extract_strided_slice %5 {offsets = [56, 0], sizes = [8, 32], strides = [1, 1]} : vector<64x32xf32> to vector<8x32xf32>
    %110 = arith.truncf %97 : vector<8x32xf32> to vector<8x32xbf16>
    %cst_44 = arith.constant dense<0.000000e+00> : vector<8x32xf32>
    %111 = tpu.matmul %110, %7, %cst_44 {dimension_numbers = #tpu.dot_dimension_numbers<[1], [0], [0], [1], [0, 0, 1, 1], [], []>} : vector<8x32xbf16>, vector<32x32xbf16>, vector<8x32xf32> -> vector<8x32xf32>
    %112 = arith.addf %109, %111 : vector<8x32xf32>
    %113 = math.tanh %112 : vector<8x32xf32>
    %114 = arith.truncf %97 : vector<8x32xf32> to vector<8x32xbf16>
    %cst_45 = arith.constant dense<0.000000e+00> : vector<8x32xf32>
    %115 = tpu.matmul %114, %11, %cst_45 {dimension_numbers = #tpu.dot_dimension_numbers<[1], [0], [0], [1], [0, 0, 1, 1], [], []>} : vector<8x32xbf16>, vector<32x32xbf16>, vector<8x32xf32> -> vector<8x32xf32>
    %116 = vector.broadcast %12 : vector<1x32xf32> to vector<8x32xf32>
    %117 = arith.addf %115, %116 : vector<8x32xf32>
    %118 = arith.truncf %105 : vector<8x32xf32> to vector<8x32xbf16>
    %cst_46 = arith.constant dense<0.000000e+00> : vector<8x32xf32>
    %119 = tpu.matmul %118, %9, %cst_46 {dimension_numbers = #tpu.dot_dimension_numbers<[1], [0], [0], [1], [0, 0, 1, 1], [], []>} : vector<8x32xbf16>, vector<32x32xbf16>, vector<8x32xf32> -> vector<8x32xf32>
    %120 = arith.addf %117, %119 : vector<8x32xf32>
    %121 = math.tanh %120 : vector<8x32xf32>
    %c192 = arith.constant 192 : index
    %c0_47 = arith.constant 0 : index
    %122 = vector.load %arg7[%c192, %c0_47] : memref<256x128xf32, #tpu.memory_space<vmem>>, vector<32x128xf32>
    %cst_48 = arith.constant dense<0.000000e+00> : vector<8x128xf32>
    %123 = tpu.matmul %121, %122, %cst_48 {dimension_numbers = #tpu.dot_dimension_numbers<[1], [0], [0], [1], [0, 0, 1, 1], [], []>} : vector<8x32xf32>, vector<32x128xf32>, vector<8x128xf32> -> vector<8x128xf32>
    %124 = arith.addf %108, %123 : vector<8x128xf32>
    %125 = arith.truncf %113 : vector<8x32xf32> to vector<8x32xbf16>
    %cst_49 = arith.constant dense<0.000000e+00> : vector<8x32xf32>
    %126 = tpu.matmul %125, %11, %cst_49 {dimension_numbers = #tpu.dot_dimension_numbers<[1], [0], [0], [1], [0, 0, 1, 1], [], []>} : vector<8x32xbf16>, vector<32x32xbf16>, vector<8x32xf32> -> vector<8x32xf32>
    %127 = vector.broadcast %12 : vector<1x32xf32> to vector<8x32xf32>
    %128 = arith.addf %126, %127 : vector<8x32xf32>
    %129 = arith.truncf %121 : vector<8x32xf32> to vector<8x32xbf16>
    %cst_50 = arith.constant dense<0.000000e+00> : vector<8x32xf32>
    %130 = tpu.matmul %129, %9, %cst_50 {dimension_numbers = #tpu.dot_dimension_numbers<[1], [0], [0], [1], [0, 0, 1, 1], [], []>} : vector<8x32xbf16>, vector<32x32xbf16>, vector<8x32xf32> -> vector<8x32xf32>
    %131 = arith.addf %128, %130 : vector<8x32xf32>
    %132 = math.tanh %131 : vector<8x32xf32>
    %c224 = arith.constant 224 : index
    %c0_51 = arith.constant 0 : index
    %133 = vector.load %arg7[%c224, %c0_51] : memref<256x128xf32, #tpu.memory_space<vmem>>, vector<32x128xf32>
    %cst_52 = arith.constant dense<0.000000e+00> : vector<8x128xf32>
    %134 = tpu.matmul %132, %133, %cst_52 {dimension_numbers = #tpu.dot_dimension_numbers<[1], [0], [0], [1], [0, 0, 1, 1], [], []>} : vector<8x32xf32>, vector<32x128xf32>, vector<8x128xf32> -> vector<8x128xf32>
    %135 = arith.addf %124, %134 : vector<8x128xf32>
    %c0_53 = arith.constant 0 : index
    %c0_54 = arith.constant 0 : index
    %136 = vector.load %arg8[%c0_53, %c0_54] : memref<1x128xf32, #tpu.memory_space<vmem>>, vector<1x128xf32>
    %137 = vector.broadcast %136 : vector<1x128xf32> to vector<8x128xf32>
    %138 = arith.addf %135, %137 : vector<8x128xf32>
    %c0_55 = arith.constant 0 : index
    %c0_56 = arith.constant 0 : index
    %139 = vector.load %arg9[%c0_55, %c0_56] : memref<8x128xf32, #tpu.memory_space<vmem>>, vector<8x128xf32>
    tpu.vector_store %arg9[%c0_55, %c0_56], %138 {strides = array<i32>} : memref<8x128xf32, #tpu.memory_space<vmem>>, vector<8x128xf32>,
    return
  }
}

</mosaic_0001>

<bundles_post_ra>
// kernel: forward.1
= control target key start
LH: loop header
LB: loop body
LE: loop exit
PB: predicated region body
PF: predicated region fallthrough
CT: control target
= control target key end

     0   :  { %14 = vsyncpa [#allocation3], 0  ;;  %s2412_s30 = smov [#allocation2]   ;;  %s2807_s0 = inlined_call_operand.vmem [shape: f32[64,16], index: 0, kind: input, shape index: {}]   ;;  %s2808_s1 = inlined_call_operand.vmem [shape: f32[16,32], index: 1, kind: input, shape index: {}]   ;;  %s2809_s2 = inlined_call_operand.vmem [shape: f32[32,32], index: 2, kind: input, shape index: {}]   ;;  %s2810_s3 = inlined_call_operand.vmem [shape: f32[1,32], index: 3, kind: input, shape index: {}]   ;;  %s2811_s4 = inlined_call_operand.vmem [shape: f32[32,32], index: 4, kind: input, shape index: {}]   ;;  %s2812_s5 = inlined_call_operand.vmem [shape: f32[32,32], index: 5, kind: input, shape index: {}]   ;;  %s2813_s6 = inlined_call_operand.vmem [shape: f32[1,32], index: 6, kind: input, shape index: {}]   ;;  %s2814_s7 = inlined_call_operand.hbm [shape: f32[256,128], index: 7, kind: input, shape index: {}]   ;;  %s2815_s8 = inlined_call_operand.vmem [shape: f32[1,128], index: 8, kind: input, shape index: {}]   ;;  %s2816_s9 = inlined_call_operand.vmem [shape: f32[8,128], index: 9, kind: output, shape index: {}]  }
   0x1   :  { %s34_s10 = sshll.u32 %s2412_s30, 4  ;;  %s2388_s13 = scalar_lea.hbm %s2814_s7, 4096  ;;  %s35_s10 = int_to_ptr.vmem [resolvable:$true] %s34_s10 }
   0x2   :  { %p2389_p0 = scmp.ne.s32.totalorder %s2814_s7, %s2388_s13  ;;  %p2392_p1 = scmp.lt.u32.totalorder %s2388_s13, %s2814_s7 }
   0x4   :  { %p2394_p2 = pnand %p2392_p1, %p2389_p0 }
   0x6   :  { %2397 = shalt.err (!%p2394_p2)
}
   0x7   :  { %s2398_s18 = scalar_lea.vmem %s35_s10, 4096  ;;  %p2403_p4 = scmp.lt.s32.totalorder %s35_s10, %s35_s10 }
   0x8   :  { %p2399_p3 = scmp.ne.s32.totalorder %s35_s10, %s2398_s18  ;;  %p2404_p5 = scmp.lt.s32.totalorder %s2398_s18, %s2398_s18 }
   0xa   :  { %p2405_p6 = por %p2404_p5, %p2403_p4 }
   0xc   :  { %p2406_p7 = pnand %p2405_p6, %p2399_p3 }
   0xe   :  { %2409 = shalt.err (!%p2406_p7)
}
   0xf   :  { %s2413_s19 = smov 128   ;;  %s2414_s20 = smov 8  }
  0x10   :  { %40 = dma.hbm_to_vmem [thread:$0]  %s2814_s7, 4096, %s35_s10, [#allocation3], %s2413_s19, %s2413_s19, %s2414_s20  }
  0x11   :  { %2410 = dma.done.wait [#allocation3], 4096  }
  0x12   :  { %2411 = vsyncadd [#allocation3], 4294963200  ;;  %vm64_vm0 = vcmask 130048   ;;  %v55_v0 = vld [vmem:[%s2808_s1] sm:$0xff]  ;;  %v56_v1 = vld [vmem:[%s2808_s1 + $0x8] sm:$0xff]  ;;  %v2415_v8 = vmov 0.0  }
  0x13   :  { %v47_v2 = vld [vmem:[%s2807_s0] sm:$0xff]  ;;  %v2263_v3 = vpack.c.bf16 %v56_v1, %v55_v0  ;;  %v48_v4 = vld [vmem:[%s2807_s0 + $0x8] sm:$0xff]  ;;  %1999 = vmatprep.subr.bf16.mxu1 %v2415_v8  ;;  %v196_v9 = vld [vmem:[%s2809_s2 + $0x10] sm:$0xff]  ;;  %vm2416_vm1 = vmmov 0   ;;  %vm215_vm2 = vcmask 261120   ;;  %v2417_v63 = vmov 0.0|0.0  }
  0x14   :  { %1987 = vmatprep.mubr.msk.f32.mxu0 %vm64_vm0, %v47_v2  ;;  %v194_v5 = vld [vmem:[%s2809_s2] sm:$0xff]  ;;  %v195_v6 = vld [vmem:[%s2809_s2 + $0x8] sm:$0xff]  ;;  %v197_v10 = vld [vmem:[%s2809_s2 + $0x18] sm:$0xff]  ;;  %2003 = vmatprep.mubr.msk.bf16.mxu1 %vm2416_vm1, %v2415_v8 }
  0x15   :  { %2264 = vmatprep.subr.bf16.mxu0 %v2263_v3  ;;  %v2500_v7 = vpack.c.bf16 %v195_v6, %v194_v5  ;;  %v2514_v11 = vpack.c.bf16 %v197_v10, %v196_v9  ;;  %v2524_v12 = vld [vmem:[%s2810_s3] ss:$0 sm:$0xff]  ;;  %v207_v17 = vld [vmem:[%s2811_s4 + $0x8] sm:$0xff]  ;;  %v208_v21 = vld [vmem:[%s2811_s4 + $0x10] sm:$0xff] }
  0x16   :  { %2266 = vmatpush3.bf16.msra.mxu0 %v2263_v3  ;;  %v206_v16 = vld [vmem:[%s2811_s4] sm:$0xff]  ;;  %v209_v22 = vld [vmem:[%s2811_s4 + $0x18] sm:$0xff]  ;;  %v49_v24 = vld [vmem:[%s2807_s0 + $0x10] sm:$0xff] }
  0x17   :  { %2015 = vmatprep.subr.bf16.mxu0 %v2415_v8  ;;  %2000 = vmatpush3.bf16.msra.mxu1 %v2500_v7  ;;  %v2533_v19 = vpack.c.bf16 %v207_v17, %v206_v16  ;;  %v2543_v23 = vpack.c.bf16 %v209_v22, %v208_v21  ;;  %v50_v25 = vld [vmem:[%s2807_s0 + $0x18] sm:$0xff]  ;;  %v51_v26 = vld [vmem:[%s2807_s0 + $0x20] sm:$0xff]  ;;  %v52_v27 = vld [vmem:[%s2807_s0 + $0x28] sm:$0xff] }
  0x18   :  { %2001 = vmatprep.subr.bf16.mxu1 %v2415_v8  ;;  %v53_v28 = vld [vmem:[%s2807_s0 + $0x30] sm:$0xff]  ;;  %v54_v29 = vld [vmem:[%s2807_s0 + $0x38] sm:$0xff]  ;;  %v2587_v36 = vld [vmem:[%s2813_s6] ss:$0 sm:$0xff] }
  0x19   :  { %1988 = vmatmul.mubr.msk.f32.vlgmr.msra.gmra.mrb[0].mxu0 %vm64_vm0, %v48_v4  ;;  %v200_v41 = vld [vmem:[%s2812_s5] sm:$0xff]  ;;  %v201_v42 = vld [vmem:[%s2812_s5 + $0x8] sm:$0xff]  ;;  %v202_v47 = vld [vmem:[%s2812_s5 + $0x10] sm:$0xff] }
  0x1a   :  { %2016 = vmatpush3.bf16.msra.mxu0 %v2500_v7  ;;  %1990 = vmatprep.mubr.msk.f32.mxu0 %vm64_vm0, %v49_v24  ;;  %v2596_v45 = vpack.c.bf16 %v201_v42, %v200_v41  ;;  %v203_v48 = vld [vmem:[%s2812_s5 + $0x18] sm:$0xff]  ;;  %v444_v58 = vld [vmem:[#allocation2 + $0x20] sm:$0xff]  ;;  %v445_v59 = vld [vmem:[#allocation2 + $0x28] sm:$0xff] }
  0x1b   :  { %2017 = vmatprep.subr.bf16.mxu0 %v2415_v8  ;;  %2002 = vmatpush3.bf16.msra.mxu1 %v2514_v11  ;;  %v2607_v49 = vpack.c.bf16 %v203_v48, %v202_v47  ;;  %v2268_v60 = vpack.c.bf16 %v445_v59, %v444_v58  ;;  %v446_v61 = vld [vmem:[#allocation2 + $0x30] sm:$0xff]  ;;  %v447_v62 = vld [vmem:[#allocation2 + $0x38] sm:$0xff] }
  0x1c   :  { %2007 = vmatprep.subr.bf16.mxu1 %v2415_v8  ;;  %v2271_v0 = vpack.c.bf16 %v447_v62, %v446_v61  ;;  %v310_v22 = vld [vmem:[#allocation2 + $0x10] sm:$0xff]  ;;  %v311_v24 = vld [vmem:[#allocation2 + $0x18] sm:$0xff]  ;;  %v936_v61 = vld [vmem:[#allocation2 + $0x60] sm:$0xff] }
  0x1d   :  { %1991 = vmatmul.mubr.msk.f32.gmra.mrb[2].mxu0 %vm64_vm0, %v50_v25  ;;  %v937_v62 = vld [vmem:[#allocation2 + $0x68] sm:$0xff] }
  0x1e   :  { %2018 = vmatpush3.bf16.msra.mxu0 %v2514_v11  ;;  %1993 = vmatprep.mubr.msk.f32.mxu0 %vm64_vm0, %v51_v26  ;;  %v2277_v26 = vpack.c.bf16 %v311_v24, %v310_v22 }
  0x1f   :  { %2267 = vmatprep.subr.bf16.mxu0 %v2417_v63 }
  0x21   :  { %1994 = vmatmul.mubr.msk.f32.gmra.mrb[4].mxu0 %vm64_vm0, %v52_v27 }
  0x22   :  { %1996 = vmatprep.mubr.msk.f32.mxu0 %vm64_vm0, %v53_v28  ;;  %v726_v28 = vld [vmem:[#allocation2 + $0x40] sm:$0xff] }
  0x25   :  { %1997 = vmatmul.mubr.msk.f32.gmra.mrb[6].mxu0 %vm64_vm0, %v54_v29  ;;  %v727_v29 = vld [vmem:[#allocation2 + $0x48] sm:$0xff] }
  0x26   :  { %2019 = vmatprep.mubr.msk.bf16.mxu0 %vm2416_vm1, %v2415_v8 }
  0xec   :  { %v1989_v13 = vpop.f32.mrb[0].mxu0 }
  0xed   :  { %v155_v14 = vpop.f32.mrb[1].mxu0  ;;  %v161_v30 = vadd.f32 %v1989_v13, %v2524_v12 }
  0xee   :  { %v156_v15 = vadd.f32 %v2524_v12, %v155_v14 }
  0xf0   :  { %2356 = vtanh.f32 %v156_v15  ;;  %v2622_v52 = vpop.f32.mrb[2].mxu0 }
  0xf1   :  { %v165_v53 = vpop.f32.mrb[3].mxu0 }
  0xf2   :  { %v166_v1 = vadd.f32 %v2524_v12, %v165_v53 }
  0xf4   :  { %v2624_v54 = vpop.f32.mrb[4].mxu0 }
  0xf5   :  { %v2626_v55 = vpop.f32.mrb[5].mxu0 }
  0xf8   :  { %v2628_v56 = vpop.f32.mrb[6].mxu0 }
  0xf9   :  { %v2630_v57 = vpop.f32.mrb[7].mxu0 }
  0xfa   :  { %v2357_v18 = vpop.eup %2356 }
  0xfb   :  { %v214_v20 = vpack.c.bf16 %v2357_v18, %v2357_v18  ;;  %v308_v18 = vld [vmem:[#allocation2] sm:$0xff] }
  0xfd   :  { %2004 = vmatmul.mubr.msk.bf16.vlgmr.msra.gmra.mrb[0].mxu1 %vm215_vm2, %v214_v20 }
  0xfe   :  { %2008 = vmatpush3.bf16.msra.mxu1 %v2533_v19  ;;  %2011 = vmatprep.mubr.msk.bf16.mxu1 %vm2416_vm1, %v2415_v8 }
  0xff   :  { %2009 = vmatprep.subr.bf16.mxu1 %v2415_v8 }
 0x102   :  { %2010 = vmatpush3.bf16.msra.mxu1 %v2543_v23 }
 0x103   :  { %2023 = vmatprep.subr.bf16.mxu1 %v2415_v8 }
 0x105   :  { %2012 = vmatmul.mubr.msk.bf16.vlgmr.msra.gmra.mrb[4].mxu1 %vm215_vm2, %v214_v20  ;;  %v309_v20 = vld [vmem:[#allocation2 + $0x8] sm:$0xff] }
 0x106   :  { %2024 = vmatpush3.bf16.msra.mxu1 %v2533_v19  ;;  %2027 = vmatprep.mubr.msk.bf16.mxu1 %vm2416_vm1, %v2415_v8  ;;  %v2274_v21 = vpack.c.bf16 %v309_v20, %v308_v18 }
 0x107   :  { %2025 = vmatprep.subr.bf16.mxu1 %v2415_v8 }
 0x10a   :  { %2026 = vmatpush3.bf16.msra.mxu1 %v2543_v23 }
 0x10b   :  { %2031 = vmatprep.subr.bf16.mxu1 %v2415_v8 }
 0x1d0   :  { %v253_v31 = vpop.f32.mrb[0].mxu1 }
 0x1d1   :  { %v259_v32 = vadd.f32 %v253_v31, %v161_v30  ;;  %v2005_v33 = vpop.f32.mrb[1].mxu1  ;;  %v728_v30 = vld [vmem:[#allocation2 + $0x50] sm:$0xff]  ;;  %v2280_v31 = vpack.c.bf16 %v727_v29, %v726_v28  ;;  %v1147_v28 = vld [vmem:[#allocation2 + $0x88] sm:$0xff] }
 0x1d2   :  { %v256_v34 = vpop.f32.mrb[2].mxu1 }
 0x1d3   :  { %2358 = vtanh.f32 %v259_v32  ;;  %v2006_v35 = vpop.f32.mrb[3].mxu1  ;;  %v729_v32 = vld [vmem:[#allocation2 + $0x58] sm:$0xff]  ;;  %v171_v34 = vadd.f32 %v2622_v52, %v2524_v12 }
 0x1d4   :  { %v2283_v33 = vpack.c.bf16 %v729_v32, %v728_v30  ;;  %v1148_v30 = vld [vmem:[#allocation2 + $0x90] sm:$0xff] }
 0x1d8   :  { %v301_v37 = vpop.f32.mrb[4].mxu1 }
 0x1d9   :  { %v302_v38 = vadd.f32 %v2587_v36, %v301_v37  ;;  %v2013_v39 = vpop.f32.mrb[5].mxu1 }
 0x1da   :  { %v304_v40 = vpop.f32.mrb[6].mxu1 }
 0x1db   :  { %v2014_v43 = vpop.f32.mrb[7].mxu1  ;;  %2360 = vtanh.f32 %v302_v38 }
 0x1dd   :  { %v2359_v44 = vpop.eup %2358 }
 0x1de   :  { %v312_v46 = vpack.c.bf16 %v2359_v44, %v2359_v44 }
 0x1e0   :  { %2020 = vmatmul.mubr.msk.bf16.vlgmr.msra.gmra.mrb[8].mxu0 %vm215_vm2, %v312_v46  ;;  %2028 = vmatmul.mubr.msk.bf16.vlgmr.msra.gmra.mrb[8].mxu1 %vm215_vm2, %v312_v46 }
 0x1e1   :  { %2032 = vmatpush3.bf16.msra.mxu1 %v2596_v45  ;;  %2035 = vmatprep.mubr.msk.bf16.mxu1 %vm2416_vm1, %v2415_v8 }
 0x1e2   :  { %2033 = vmatprep.subr.bf16.mxu1 %v2415_v8  ;;  %2047 = vmatprep.mubr.msk.f32.mxu0 %vm2416_vm1, %v2415_v8 }
 0x1e3   :  { %2269 = vmatpush3.bf16.msra.mxu0 %v2268_v60 }
 0x1e4   :  { %2270 = vmatprep.subr.bf16.mxu0 %v2417_v63 }
 0x1e5   :  { %2034 = vmatpush3.bf16.msra.mxu1 %v2607_v49  ;;  %v2361_v50 = vpop.eup %2360 }
 0x1e6   :  { %2061 = vmatprep.subr.bf16.mxu1 %v2415_v8  ;;  %v398_v51 = vpack.c.bf16 %v2361_v50, %v2361_v50 }
 0x1e7   :  { %2272 = vmatpush3.bf16.msra.mxu0 %v2271_v0  ;;  %v2286_v0 = vpack.c.bf16 %v937_v62, %v936_v61  ;;  %v1359_v61 = vld [vmem:[#allocation2 + $0xb8] sm:$0xff] }
 0x1e8   :  { %2273 = vmatprep.subr.bf16.mxu0 %v2417_v63 }
 0x1ec   :  { %2036 = vmatmul.mubr.msk.bf16.vlgmr.msra.gmra.mrb[8].mxu1 %vm215_vm2, %v398_v51 }
 0x1ed   :  { %2062 = vmatpush3.bf16.msra.mxu1 %v2500_v7  ;;  %2065 = vmatprep.mubr.msk.bf16.mxu1 %vm2416_vm1, %v2415_v8 }
 0x1ee   :  { %2063 = vmatprep.subr.bf16.mxu1 %v2415_v8 }
 0x1f1   :  { %2064 = vmatpush3.bf16.msra.mxu1 %v2514_v11 }
 0x1f2   :  { %2279 = vmatprep.subr.bf16.mxu1 %v2417_v63 }
 0x2b3   :  { %v350_v2 = vpop.f32.mrb[8].mxu0 }
 0x2b4   :  { %v356_v3 = vadd.f32 %v350_v2, %v166_v1  ;;  %v2021_v4 = vpop.f32.mrb[9].mxu0  ;;  %v938_v1 = vld [vmem:[#allocation2 + $0x70] sm:$0xff]  ;;  %v939_v2 = vld [vmem:[#allocation2 + $0x78] sm:$0xff] }
 0x2b5   :  { %v353_v5 = vpop.f32.mrb[10].mxu0 }
 0x2b6   :  { %2362 = vtanh.f32 %v356_v3  ;;  %v2022_v6 = vpop.f32.mrb[11].mxu0  ;;  %v2289_v3 = vpack.c.bf16 %v939_v2, %v938_v1 }
 0x2bf   :  { %v436_v9 = vpop.f32.mrb[8].mxu1 }
 0x2c0   :  { %v2363_v10 = vpop.eup %2362  ;;  %v2315_v13 = vadd.f32 %v2587_v36, %v436_v9  ;;  %v2037_v14 = vpop.f32.mrb[9].mxu1 }
 0x2c1   :  { %v594_v15 = vpack.c.bf16 %v2363_v10, %v2363_v10  ;;  %v439_v16 = vpop.f32.mrb[10].mxu1 }
 0x2c2   :  { %2364 = vtanh.f32 %v2315_v13  ;;  %v2038_v17 = vpop.f32.mrb[11].mxu1  ;;  %v176_v16 = vadd.f32 %v2524_v12, %v2626_v55 }
 0x2c3   :  { %2066 = vmatmul.mubr.msk.bf16.vlgmr.msra.gmra.mrb[12].mxu1 %vm215_vm2, %v594_v15 }
 0x2c4   :  { %2093 = vmatprep.mubr.msk.f32.mxu1 %vm2416_vm1, %v2415_v8  ;;  %2281 = vmatpush3.bf16.msra.mxu1 %v2280_v31  ;;  %v1149_v31 = vld [vmem:[#allocation2 + $0x98] sm:$0xff] }
 0x2c5   :  { %2282 = vmatprep.subr.bf16.mxu1 %v2417_v63  ;;  %v2295_v32 = vpack.c.bf16 %v1149_v31, %v1148_v30 }
 0x2c8   :  { %2284 = vmatpush3.bf16.msra.mxu1 %v2283_v33 }
 0x2c9   :  { %2096 = vmatprep.subr.bf16.mxu1 %v2415_v8 }
 0x2cc   :  { %v2365_v25 = vpop.eup %2364 }
 0x2cd   :  { %2048 = vmatmul.mubr.msk.f32.vlgmr.msra.gmra.mrb[12].mxu0 %vm215_vm2, %v2365_v25  ;;  %v680_v27 = vpack.c.bf16 %v2365_v25, %v2365_v25 }
 0x2ce   :  { %2275 = vmatpush3.bf16.msra.mxu0 %v2274_v21  ;;  %2058 = vmatprep.mubr.msk.f32.mxu0 %vm2416_vm1, %v2415_v8 }
 0x2cf   :  { %2276 = vmatprep.subr.bf16.mxu0 %v2417_v63 }
 0x2d2   :  { %2278 = vmatpush3.bf16.msra.mxu0 %v2277_v26 }
 0x2d3   :  { %2069 = vmatprep.subr.bf16.mxu0 %v2415_v8 }
 0x2d5   :  { %2059 = vmatmul.mubr.msk.f32.vlgmr.msra.gmra.mrb[14].mxu0 %vm215_vm2, %v2361_v50 }
 0x2d6   :  { %2070 = vmatpush3.bf16.msra.mxu0 %v2533_v19  ;;  %2073 = vmatprep.mubr.msk.bf16.mxu0 %vm2416_vm1, %v2415_v8 }
 0x2d7   :  { %2071 = vmatprep.subr.bf16.mxu0 %v2415_v8 }
 0x2da   :  { %2072 = vmatpush3.bf16.msra.mxu0 %v2543_v23 }
 0x2db   :  { %2077 = vmatprep.subr.bf16.mxu0 %v2415_v8 }
 0x2dd   :  { %2074 = vmatmul.mubr.msk.bf16.vlgmr.msra.gmra.mrb[16].mxu0 %vm215_vm2, %v594_v15 }
 0x2de   :  { %2078 = vmatpush3.bf16.msra.mxu0 %v2596_v45  ;;  %2081 = vmatprep.mubr.msk.bf16.mxu0 %vm2416_vm1, %v2415_v8 }
 0x2df   :  { %2079 = vmatprep.subr.bf16.mxu0 %v2415_v8 }
 0x2e2   :  { %2080 = vmatpush3.bf16.msra.mxu0 %v2607_v49 }
 0x2e3   :  { %2104 = vmatprep.subr.bf16.mxu0 %v2415_v8 }
 0x2e9   :  { %2082 = vmatmul.mubr.msk.bf16.vlgmr.msra.gmra.mrb[16].mxu0 %vm215_vm2, %v680_v27  ;;  %v1146_v27 = vld [vmem:[#allocation2 + $0x80] sm:$0xff] }
 0x2ea   :  { %2105 = vmatpush3.bf16.msra.mxu0 %v2533_v19  ;;  %2108 = vmatprep.mubr.msk.bf16.mxu0 %vm2416_vm1, %v2415_v8  ;;  %v2292_v29 = vpack.c.bf16 %v1147_v28, %v1146_v27 }
 0x2eb   :  { %2106 = vmatprep.subr.bf16.mxu0 %v2415_v8 }
 0x2ee   :  { %2107 = vmatpush3.bf16.msra.mxu0 %v2543_v23 }
 0x2ef   :  { %2112 = vmatprep.subr.bf16.mxu0 %v2415_v8 }
 0x396   :  { %v632_v35 = vpop.f32.mrb[12].mxu1 }
 0x397   :  { %v638_v37 = vadd.f32 %v632_v35, %v171_v34  ;;  %v2067_v38 = vpop.f32.mrb[13].mxu1 }
 0x398   :  { %v635_v39 = vpop.f32.mrb[14].mxu1 }
 0x399   :  { %2366 = vtanh.f32 %v638_v37  ;;  %v2068_v40 = vpop.f32.mrb[15].mxu1  ;;  %v181_v37 = vadd.f32 %v2624_v54, %v2524_v12 }
 0x3a0   :  { %v517_v41 = vpop.f32.mrb[12].mxu0 }
 0x3a1   :  { %v2049_v42 = vpop.f32.mrb[13].mxu0 }
 0x3a3   :  { %v2367_v43 = vpop.eup %2366 }
 0x3a4   :  { %v804_v44 = vpack.c.bf16 %v2367_v43, %v2367_v43 }
 0x3a6   :  { %2109 = vmatmul.mubr.msk.bf16.vlgmr.msra.gmra.mrb[20].mxu0 %vm215_vm2, %v804_v44 }
 0x3a7   :  { %2113 = vmatpush3.bf16.msra.mxu0 %v2596_v45  ;;  %2116 = vmatprep.mubr.msk.bf16.mxu0 %vm2416_vm1, %v2415_v8 }
 0x3a8   :  { %v590_v46 = vpop.f32.mrb[14].mxu0  ;;  %2114 = vmatprep.subr.bf16.mxu0 %v2415_v8 }
 0x3a9   :  { %v591_v47 = vadd.f32 %v590_v46, %v517_v41  ;;  %v2060_v48 = vpop.f32.mrb[15].mxu0 }
 0x3ab   :  { %2115 = vmatpush3.bf16.msra.mxu0 %v2607_v49 }
 0x3ac   :  { %2139 = vmatprep.subr.bf16.mxu0 %v2415_v8 }
 0x3bc   :  { %v718_v50 = vpop.f32.mrb[16].mxu0 }
 0x3bd   :  { %v2316_v51 = vadd.f32 %v2587_v36, %v718_v50  ;;  %v2083_v52 = vpop.f32.mrb[17].mxu0 }
 0x3be   :  { %v721_v53 = vpop.f32.mrb[18].mxu0 }
 0x3bf   :  { %2368 = vtanh.f32 %v2316_v51  ;;  %v2084_v58 = vpop.f32.mrb[19].mxu0  ;;  %v1356_v53 = vld [vmem:[#allocation2 + $0xa0] sm:$0xff] }
 0x3c0   :  { %v1357_v58 = vld [vmem:[#allocation2 + $0xa8] sm:$0xff] }
 0x3c9   :  { %v2369_v59 = vpop.eup %2368 }
 0x3ca   :  { %2094 = vmatmul.mubr.msk.f32.vlgmr.msra.gmra.mrb[16].mxu1 %vm215_vm2, %v2369_v59  ;;  %v890_v60 = vpack.c.bf16 %v2369_v59, %v2369_v59  ;;  %v2298_v59 = vpack.c.bf16 %v1357_v58, %v1356_v53 }
 0x3cb   :  { %2097 = vmatpush3.bf16.msra.mxu1 %v2500_v7  ;;  %2100 = vmatprep.mubr.msk.bf16.mxu1 %vm2416_vm1, %v2415_v8 }
 0x3cc   :  { %2117 = vmatmul.mubr.msk.bf16.vlgmr.msra.gmra.mrb[20].mxu0 %vm215_vm2, %v890_v60  ;;  %2098 = vmatprep.subr.bf16.mxu1 %v2415_v8  ;;  %v1358_v60 = vld [vmem:[#allocation2 + $0xb0] sm:$0xff] }
 0x3cd   :  { %2140 = vmatpush3.bf16.msra.mxu0 %v2533_v19  ;;  %2143 = vmatprep.mubr.msk.bf16.mxu0 %vm2416_vm1, %v2415_v8  ;;  %v2301_v62 = vpack.c.bf16 %v1359_v61, %v1358_v60 }
 0x3ce   :  { %2141 = vmatprep.subr.bf16.mxu0 %v2415_v8 }
 0x3cf   :  { %2099 = vmatpush3.bf16.msra.mxu1 %v2514_v11 }
 0x3d0   :  { %2285 = vmatprep.subr.bf16.mxu1 %v2417_v63 }
 0x3d1   :  { %2142 = vmatpush3.bf16.msra.mxu0 %v2543_v23 }
 0x3d2   :  { %2101 = vmatmul.mubr.msk.bf16.vlgmr.msra.gmra.mrb[20].mxu1 %vm215_vm2, %v804_v44  ;;  %2147 = vmatprep.subr.bf16.mxu0 %v2415_v8 }
 0x3d3   :  { %2128 = vmatprep.mubr.msk.f32.mxu1 %vm2416_vm1, %v2415_v8  ;;  %2287 = vmatpush3.bf16.msra.mxu1 %v2286_v0 }
 0x3d4   :  { %2288 = vmatprep.subr.bf16.mxu1 %v2417_v63 }
 0x3d7   :  { %2290 = vmatpush3.bf16.msra.mxu1 %v2289_v3 }
 0x3d8   :  { %2131 = vmatprep.subr.bf16.mxu1 %v2415_v8 }
 0x49d   :  { %v799_v4 = vpop.f32.mrb[16].mxu1 }
 0x49e   :  { %v803_v5 = vadd.f32 %v799_v4, %v591_v47  ;;  %v2095_v6 = vpop.f32.mrb[17].mxu1 }
 0x49f   :  { %v928_v9 = vpop.f32.mrb[20].mxu0 }
 0x4a0   :  { %v2317_v10 = vadd.f32 %v2587_v36, %v928_v9  ;;  %v2118_v13 = vpop.f32.mrb[21].mxu0 }
 0x4a1   :  { %v931_v14 = vpop.f32.mrb[22].mxu0 }
 0x4a2   :  { %2370 = vtanh.f32 %v2317_v10  ;;  %v2119_v15 = vpop.f32.mrb[23].mxu0  ;;  %v186_v10 = vadd.f32 %v2524_v12, %v2630_v57 }
 0x4a5   :  { %v842_v17 = vpop.f32.mrb[20].mxu1 }
 0x4a6   :  { %v848_v18 = vadd.f32 %v842_v17, %v176_v16  ;;  %v2102_v20 = vpop.f32.mrb[21].mxu1 }
 0x4a7   :  { %v845_v21 = vpop.f32.mrb[22].mxu1 }
 0x4a8   :  { %2372 = vtanh.f32 %v848_v18  ;;  %v2103_v22 = vpop.f32.mrb[23].mxu1  ;;  %v1567_v21 = vld [vmem:[#allocation2 + $0xc8] sm:$0xff] }
 0x4a9   :  { %v1568_v22 = vld [vmem:[#allocation2 + $0xd0] sm:$0xff] }
 0x4ac   :  { %v2371_v24 = vpop.eup %2370 }
 0x4ad   :  { %2129 = vmatmul.mubr.msk.f32.vlgmr.msra.gmra.mrb[18].mxu1 %vm215_vm2, %v2371_v24  ;;  %v1100_v26 = vpack.c.bf16 %v2371_v24, %v2371_v24 }
 0x4ae   :  { %2132 = vmatpush3.bf16.msra.mxu1 %v2500_v7  ;;  %2135 = vmatprep.mubr.msk.bf16.mxu1 %vm2416_vm1, %v2415_v8 }
 0x4af   :  { %2133 = vmatprep.subr.bf16.mxu1 %v2415_v8 }
 0x4b2   :  { %v2373_v25 = vpop.eup %2372  ;;  %2134 = vmatpush3.bf16.msra.mxu1 %v2514_v11 }
 0x4b3   :  { %v1014_v55 = vpack.c.bf16 %v2373_v25, %v2373_v25  ;;  %2291 = vmatprep.subr.bf16.mxu1 %v2417_v63  ;;  %v1569_v25 = vld [vmem:[#allocation2 + $0xd8] sm:$0xff] }
 0x4b5   :  { %2136 = vmatmul.mubr.msk.bf16.vlgmr.msra.gmra.mrb[24].mxu1 %vm215_vm2, %v1014_v55  ;;  %2144 = vmatmul.mubr.msk.bf16.vlgmr.msra.gmra.mrb[24].mxu0 %vm215_vm2, %v1014_v55  ;;  %v2307_v55 = vpack.c.bf16 %v1569_v25, %v1568_v22 }
 0x4b6   :  { %2148 = vmatpush3.bf16.msra.mxu0 %v2596_v45  ;;  %2151 = vmatprep.mubr.msk.bf16.mxu0 %vm2416_vm1, %v2415_v8 }
 0x4b7   :  { %2149 = vmatprep.subr.bf16.mxu0 %v2415_v8  ;;  %2163 = vmatprep.mubr.msk.f32.mxu1 %vm2416_vm1, %v2415_v8 }
 0x4b8   :  { %2293 = vmatpush3.bf16.msra.mxu1 %v2292_v29  ;;  %v191_v29 = vadd.f32 %v2628_v56, %v2524_v12 }
 0x4b9   :  { %2294 = vmatprep.subr.bf16.mxu1 %v2417_v63 }
 0x4ba   :  { %2150 = vmatpush3.bf16.msra.mxu0 %v2607_v49 }
 0x4bb   :  { %2174 = vmatprep.subr.bf16.mxu0 %v2415_v8 }
 0x4bc   :  { %2296 = vmatpush3.bf16.msra.mxu1 %v2295_v32 }
 0x4bd   :  { %2166 = vmatprep.subr.bf16.mxu1 %v2415_v8 }
 0x4c1   :  { %2152 = vmatmul.mubr.msk.bf16.vlgmr.msra.gmra.mrb[24].mxu0 %vm215_vm2, %v1100_v26 }
 0x4c2   :  { %2175 = vmatpush3.bf16.msra.mxu0 %v2533_v19  ;;  %2178 = vmatprep.mubr.msk.bf16.mxu0 %vm2416_vm1, %v2415_v8 }
 0x4c3   :  { %2176 = vmatprep.subr.bf16.mxu0 %v2415_v8 }
 0x4c6   :  { %2177 = vmatpush3.bf16.msra.mxu0 %v2543_v23 }
 0x4c7   :  { %2182 = vmatprep.subr.bf16.mxu0 %v2415_v8 }
 0x580   :  { %v1009_v33 = vpop.f32.mrb[18].mxu1 }
 0x581   :  { %v1013_v34 = vadd.f32 %v1009_v33, %v803_v5  ;;  %v2130_v35 = vpop.f32.mrb[19].mxu1 }
 0x588   :  { %v1052_v38 = vpop.f32.mrb[24].mxu1 }
 0x589   :  { %v1058_v39 = vadd.f32 %v1052_v38, %v181_v37  ;;  %v2137_v40 = vpop.f32.mrb[25].mxu1 }
 0x58a   :  { %v1055_v41 = vpop.f32.mrb[26].mxu1 }
 0x58b   :  { %2374 = vtanh.f32 %v1058_v39  ;;  %v2138_v42 = vpop.f32.mrb[27].mxu1 }
 0x58c   :  { %v1734_v42 = vld [vmem:[#allocation2 + $0xe0] sm:$0xff] }
 0x594   :  { %v1138_v43 = vpop.f32.mrb[24].mxu0 }
 0x595   :  { %v2375_v44 = vpop.eup %2374  ;;  %v2318_v46 = vadd.f32 %v2587_v36, %v1138_v43  ;;  %v2153_v47 = vpop.f32.mrb[25].mxu0  ;;  %v1735_v43 = vld [vmem:[#allocation2 + $0xe8] sm:$0xff] }
 0x596   :  { %v1224_v48 = vpack.c.bf16 %v2375_v44, %v2375_v44  ;;  %v1141_v50 = vpop.f32.mrb[26].mxu0  ;;  %v2310_v44 = vpack.c.bf16 %v1735_v43, %v1734_v42 }
 0x597   :  { %2376 = vtanh.f32 %v2318_v46  ;;  %v2154_v51 = vpop.f32.mrb[27].mxu0  ;;  %v1737_v46 = vld [vmem:[#allocation2 + $0xf8] sm:$0xff] }
 0x598   :  { %2179 = vmatmul.mubr.msk.bf16.vlgmr.msra.gmra.mrb[28].mxu0 %vm215_vm2, %v1224_v48 }
 0x599   :  { %2183 = vmatpush3.bf16.msra.mxu0 %v2596_v45  ;;  %2186 = vmatprep.mubr.msk.bf16.mxu0 %vm2416_vm1, %v2415_v8 }
 0x59a   :  { %2184 = vmatprep.subr.bf16.mxu0 %v2415_v8 }
 0x59d   :  { %2185 = vmatpush3.bf16.msra.mxu0 %v2607_v49 }
 0x59e   :  { %2209 = vmatprep.subr.bf16.mxu0 %v2415_v8 }
 0x5a1   :  { %v2377_v54 = vpop.eup %2376 }
 0x5a2   :  { %2164 = vmatmul.mubr.msk.f32.vlgmr.msra.gmra.mrb[28].mxu1 %vm215_vm2, %v2377_v54  ;;  %v1310_v52 = vpack.c.bf16 %v2377_v54, %v2377_v54 }
 0x5a3   :  { %2167 = vmatpush3.bf16.msra.mxu1 %v2500_v7  ;;  %2170 = vmatprep.mubr.msk.bf16.mxu1 %vm2416_vm1, %v2415_v8 }
 0x5a4   :  { %2187 = vmatmul.mubr.msk.bf16.vlgmr.msra.gmra.mrb[28].mxu0 %vm215_vm2, %v1310_v52  ;;  %2168 = vmatprep.subr.bf16.mxu1 %v2415_v8 }
 0x5a5   :  { %2210 = vmatpush3.bf16.msra.mxu0 %v2533_v19  ;;  %2213 = vmatprep.mubr.msk.bf16.mxu0 %vm2416_vm1, %v2415_v8 }
 0x5a6   :  { %2211 = vmatprep.subr.bf16.mxu0 %v2415_v8 }
 0x5a7   :  { %2169 = vmatpush3.bf16.msra.mxu1 %v2514_v11 }
 0x5a8   :  { %2297 = vmatprep.subr.bf16.mxu1 %v2417_v63 }
 0x5a9   :  { %2212 = vmatpush3.bf16.msra.mxu0 %v2543_v23 }
 0x5aa   :  { %2171 = vmatmul.mubr.msk.bf16.vlgmr.msra.gmra.mrb[32].mxu1 %vm215_vm2, %v1224_v48  ;;  %2217 = vmatprep.subr.bf16.mxu0 %v2415_v8 }
 0x5ab   :  { %2198 = vmatprep.mubr.msk.f32.mxu1 %vm2416_vm1, %v2415_v8  ;;  %2299 = vmatpush3.bf16.msra.mxu1 %v2298_v59  ;;  %v1866_v59 = vld [vmem:[%s2815_s8] ss:$0 sm:$0xff] }
 0x5ac   :  { %2300 = vmatprep.subr.bf16.mxu1 %v2417_v63 }
 0x5af   :  { %2302 = vmatpush3.bf16.msra.mxu1 %v2301_v62 }
 0x5b0   :  { %2201 = vmatprep.subr.bf16.mxu1 %v2415_v8 }
 0x675   :  { %v1219_v0 = vpop.f32.mrb[28].mxu1 }
 0x676   :  { %v1223_v1 = vadd.f32 %v1219_v0, %v1013_v34  ;;  %v2165_v2 = vpop.f32.mrb[29].mxu1 }
 0x677   :  { %v1348_v3 = vpop.f32.mrb[28].mxu0 }
 0x678   :  { %v2319_v4 = vadd.f32 %v2587_v36, %v1348_v3  ;;  %v2188_v5 = vpop.f32.mrb[29].mxu0 }
 0x679   :  { %v1351_v6 = vpop.f32.mrb[30].mxu0 }
 0x67a   :  { %2378 = vtanh.f32 %v2319_v4  ;;  %v2189_v9 = vpop.f32.mrb[31].mxu0 }
 0x67d   :  { %v1262_v13 = vpop.f32.mrb[32].mxu1 }
 0x67e   :  { %v1268_v14 = vadd.f32 %v1262_v13, %v186_v10  ;;  %v2172_v15 = vpop.f32.mrb[33].mxu1 }
 0x67f   :  { %v1265_v16 = vpop.f32.mrb[34].mxu1 }
 0x680   :  { %2380 = vtanh.f32 %v1268_v14  ;;  %v2173_v17 = vpop.f32.mrb[35].mxu1 }
 0x684   :  { %v2379_v18 = vpop.eup %2378 }
 0x685   :  { %2199 = vmatmul.mubr.msk.f32.vlgmr.msra.gmra.mrb[30].mxu1 %vm215_vm2, %v2379_v18 }
 0x686   :  { %2202 = vmatpush3.bf16.msra.mxu1 %v2500_v7  ;;  %2205 = vmatprep.mubr.msk.bf16.mxu1 %vm2416_vm1, %v2415_v8  ;;  %v1520_v7 = vpack.c.bf16 %v2379_v18, %v2379_v18 }
 0x687   :  { %2203 = vmatprep.subr.bf16.mxu1 %v2415_v8 }
 0x68a   :  { %v2381_v20 = vpop.eup %2380  ;;  %2204 = vmatpush3.bf16.msra.mxu1 %v2514_v11  ;;  %v1566_v11 = vld [vmem:[#allocation2 + $0xc0] sm:$0xff] }
 0x68b   :  { %v1434_v57 = vpack.c.bf16 %v2381_v20, %v2381_v20  ;;  %2303 = vmatprep.subr.bf16.mxu1 %v2417_v63  ;;  %v2304_v24 = vpack.c.bf16 %v1567_v21, %v1566_v11 }
 0x68d   :  { %2206 = vmatmul.mubr.msk.bf16.vlgmr.msra.gmra.mrb[36].mxu1 %vm215_vm2, %v1434_v57  ;;  %2214 = vmatmul.mubr.msk.bf16.vlgmr.msra.gmra.mrb[32].mxu0 %vm215_vm2, %v1434_v57 }
 0x68e   :  { %2218 = vmatpush3.bf16.msra.mxu0 %v2596_v45  ;;  %2221 = vmatprep.mubr.msk.bf16.mxu0 %vm2416_vm1, %v2415_v8 }
 0x68f   :  { %2219 = vmatprep.subr.bf16.mxu0 %v2415_v8  ;;  %2233 = vmatprep.mubr.msk.f32.mxu1 %vm2416_vm1, %v2415_v8 }
 0x690   :  { %2305 = vmatpush3.bf16.msra.mxu1 %v2304_v24 }
 0x691   :  { %2306 = vmatprep.subr.bf16.mxu1 %v2417_v63 }
 0x692   :  { %2220 = vmatpush3.bf16.msra.mxu0 %v2607_v49 }
 0x693   :  { %2309 = vmatprep.subr.bf16.mxu0 %v2417_v63 }
 0x694   :  { %2308 = vmatpush3.bf16.msra.mxu1 %v2307_v55 }
 0x695   :  { %2236 = vmatprep.subr.bf16.mxu1 %v2415_v8 }
 0x699   :  { %2222 = vmatmul.mubr.msk.bf16.vlgmr.msra.gmra.mrb[32].mxu0 %vm215_vm2, %v1520_v7 }
 0x69a   :  { %2260 = vmatprep.mubr.msk.f32.mxu0 %vm2416_vm1, %v2415_v8  ;;  %2311 = vmatpush3.bf16.msra.mxu0 %v2310_v44 }
 0x69b   :  { %2312 = vmatprep.subr.bf16.mxu0 %v2417_v63 }
 0x758   :  { %v1429_v26 = vpop.f32.mrb[30].mxu1 }
 0x759   :  { %v1433_v27 = vadd.f32 %v1429_v26, %v1223_v1  ;;  %v2200_v28 = vpop.f32.mrb[31].mxu1 }
 0x760   :  { %v1472_v30 = vpop.f32.mrb[36].mxu1 }
 0x761   :  { %v1478_v31 = vadd.f32 %v1472_v30, %v191_v29  ;;  %v2207_v32 = vpop.f32.mrb[37].mxu1 }
 0x762   :  { %v1475_v33 = vpop.f32.mrb[38].mxu1 }
 0x763   :  { %v2208_v34 = vpop.f32.mrb[39].mxu1 }
 0x76c   :  { %v1558_v35 = vpop.f32.mrb[32].mxu0 }
 0x76d   :  { %v2320_v37 = vadd.f32 %v2587_v36, %v1558_v35  ;;  %v2223_v38 = vpop.f32.mrb[33].mxu0 }
 0x76e   :  { %v1561_v39 = vpop.f32.mrb[34].mxu0 }
 0x76f   :  { %2382 = vtanh.f32 %v2320_v37  ;;  %v2224_v40 = vpop.f32.mrb[35].mxu0 }
 0x770   :  { %2384 = vtanh.f32 %v1478_v31 }
 0x779   :  { %v2383_v41 = vpop.eup %2382 }
 0x77a   :  { %2234 = vmatmul.mubr.msk.f32.vlgmr.msra.gmra.mrb[40].mxu1 %vm215_vm2, %v2383_v41  ;;  %v2385_v12 = vpop.eup %2384 }
 0x77b   :  { %2237 = vmatpush3.bf16.msra.mxu1 %v2533_v19  ;;  %2240 = vmatprep.mubr.msk.bf16.mxu1 %vm2416_vm1, %v2415_v8  ;;  %v1644_v56 = vpack.c.bf16 %v2385_v12, %v2385_v12  ;;  %v1688_v19 = vpack.c.bf16 %v2383_v41, %v2383_v41 }
 0x77c   :  { %2238 = vmatprep.subr.bf16.mxu1 %v2415_v8 }
 0x77f   :  { %2239 = vmatpush3.bf16.msra.mxu1 %v2543_v23  ;;  %v1736_v23 = vld [vmem:[#allocation2 + $0xf0] sm:$0xff] }
 0x780   :  { %2244 = vmatprep.subr.bf16.mxu1 %v2415_v8  ;;  %v2313_v47 = vpack.c.bf16 %v1737_v46, %v1736_v23 }
 0x782   :  { %2241 = vmatmul.mubr.msk.bf16.vlgmr.msra.gmra.mrb[44].mxu1 %vm215_vm2, %v1644_v56  ;;  %2314 = vmatpush3.bf16.msra.mxu0 %v2313_v47 }
 0x783   :  { %2245 = vmatpush3.bf16.msra.mxu1 %v2596_v45  ;;  %2248 = vmatprep.mubr.msk.bf16.mxu1 %vm2416_vm1, %v2415_v8 }
 0x784   :  { %2246 = vmatprep.subr.bf16.mxu1 %v2415_v8 }
 0x787   :  { %2247 = vmatpush3.bf16.msra.mxu1 %v2607_v49 }
 0x78e   :  { %2249 = vmatmul.mubr.msk.bf16.vlgmr.msra.gmra.mrb[44].mxu1 %vm215_vm2, %v1688_v19 }
 0x84d   :  { %v1639_v45 = vpop.f32.mrb[40].mxu1 }
 0x84e   :  { %v1643_v48 = vadd.f32 %v1639_v45, %v1433_v27  ;;  %v2235_v50 = vpop.f32.mrb[41].mxu1 }
 0x861   :  { %v1726_v51 = vpop.f32.mrb[44].mxu1 }
 0x862   :  { %v2321_v8 = vadd.f32 %v2587_v36, %v1726_v51  ;;  %v2250_v49 = vpop.f32.mrb[45].mxu1 }
 0x863   :  { %v1729_v54 = vpop.f32.mrb[46].mxu1 }
 0x864   :  { %2386 = vtanh.f32 %v2321_v8  ;;  %v2251_v52 = vpop.f32.mrb[47].mxu1 }
 0x86e   :  { %v2387_v53 = vpop.eup %2386 }
 0x86f   :  { %2261 = vmatmul.mubr.msk.f32.vlgmr.msra.gmra.mrb[36].mxu0 %vm215_vm2, %v2387_v53 }
 0x942   :  { %v1807_v58 = vpop.f32.mrb[36].mxu0 }
 0x943   :  { %v1811_v63 = vadd.f32 %v1807_v58, %v1643_v48  ;;  %v2262_v60 = vpop.f32.mrb[37].mxu0 }
 0x945   :  { %v1819_v61 = vadd.f32 %v1866_v59, %v1811_v63 }
 0x947   :  { %1820 = vst [vmem:[%s2816_s9] sm:$0xff] %v1819_v61 }
 0x948   :  { %1825 = vsyncpa [#allocation3], 1 }

</bundles_post_ra>
